<compile_context>
chip_gen: v6e
topology: v6e:2x2x1
jax: 0.10.0
libtpu: 0.0.40
codegen_flags: <defaults>
</compile_context>

<pallas_src>
import jax
import jax.numpy as jnp
from jax.experimental import pallas as pl
from jax.experimental.pallas import tpu as pltpu


NEG_SLOPE = 0.01          # nn.LeakyReLU() default negative_slope
LANE = 128
SUBLANE_BF16 = 16         # packed bf16: one vreg holds 16 sublanes


def _leaky_relu(v):
    # For 0 < slope < 1: max(v, slope*v) == leaky_relu(v).  mul+max (2 VALU ops).
    return jnp.maximum(v, NEG_SLOPE * v)


def _round_up(n, m):
    return ((n + m - 1) // m) * m


def _pad2d(x, rows, cols):
    return jnp.pad(x, ((0, rows - x.shape[0]), (0, cols - x.shape[1])))


# ----------------------------------------------------------------------------
# Kernel
# ----------------------------------------------------------------------------
def server_alexnet_kernel(x_ref, w2_ref, b2_ref, w3_ref, b3_ref,
                          w45_ref, b45_ref, o_ref):
    mm = w2_ref.dtype                     # bf16 weights -> bf16 MXU operands

    # fc2: Linear + LeakyReLU  (x already bf16, lane-dense K=128)
    h = jnp.dot(x_ref[...], w2_ref[...],
                preferred_element_type=jnp.float32) + b2_ref[...]
    h = _leaky_relu(h)                    # f32 elementwise on the VPU

    # fc3: Linear + LeakyReLU
    h = jnp.dot(h.astype(mm), w3_ref[...],
                preferred_element_type=jnp.float32) + b3_ref[...]
    h = _leaky_relu(h)

    # fc4 . fc5 fused: single Linear (weights fused on the host in f32)
    h = jnp.dot(h.astype(mm), w45_ref[...],
                preferred_element_type=jnp.float32) + b45_ref[...]

    # Narrow f32 writeback: only the real class columns leave the kernel.
    o_ref[...] = h[:, :o_ref.shape[1]].astype(o_ref.dtype)


# ----------------------------------------------------------------------------
# Host-side wrapper
# ----------------------------------------------------------------------------
def server_alexnet_forward(x1, x2, packed, *, tb_max=1024):
    """Fused MLP head: batch-tiled pipeline, resident bf16 weights, narrow output."""
    B = x1.shape[0]
    nc = packed["num_classes"]

    # Host-side concat + bf16 cast -> one lane-dense (B, 128) bf16 activation.
    x = jnp.concatenate([x1, x2], axis=1).astype(jnp.bfloat16)
    d = x.shape[1]

    # Adaptive batch tile: multiple of 16 sublanes (packed bf16), <= tb_max,
    # >= 2 grid steps for large batches (v7x megacore), >= 256 rows/step when
    # the batch allows it.
    b_rounded = _round_up(B, SUBLANE_BF16)
    n_steps = pl.cdiv(b_rounded, tb_max)
    if b_rounded >= 512:
        n_steps = max(n_steps, 2)
    tb = _round_up(pl.cdiv(b_rounded, n_steps), SUBLANE_BF16)
    b_pad = _round_up(b_rounded, tb)
    if b_pad != B:
        x = jnp.pad(x, ((0, b_pad - B), (0, 0)))

    args = (x, packed["w2"], packed["b2"], packed["w3"], packed["b3"],
            packed["w45"], packed["b45"])

    def resident_spec(a):
        # Same block index every grid step -> DMA'd once, stays VMEM-resident.
        return pl.BlockSpec(a.shape, lambda i: (0, 0))

    in_specs = [pl.BlockSpec((tb, d), lambda i: (i, 0))] \
        + [resident_spec(a) for a in args[1:]]
    out_spec = pl.BlockSpec((tb, nc), lambda i: (i, 0))

    h3 = packed["w2"].shape[1]
    h4 = packed["w3"].shape[1]
    ncp = packed["w45"].shape[1]
    flops = 2 * b_pad * (d * h3 + h3 * h4 + h4 * ncp)
    bytes_accessed = int(
        x.size * x.dtype.itemsize
        + sum(int(a.size) * a.dtype.itemsize for a in args[1:])
        + b_pad * nc * 4
    )

    out = pl.pallas_call(
        server_alexnet_kernel,
        out_shape=jax.ShapeDtypeStruct((b_pad, nc), jnp.float32),
        grid=(b_pad // tb,),
        in_specs=in_specs,
        out_specs=out_spec,
        compiler_params=pltpu.CompilerParams(
            dimension_semantics=("parallel",)),
        cost_estimate=pl.CostEstimate(
            flops=int(flops), transcendentals=0, bytes_accessed=bytes_accessed),
    )(*args)

    return out[:B]


# ----------------------------------------------------------------------------
# Parameter construction / packing
# ----------------------------------------------------------------------------
def init_params(key, hideen2=128, hideen3=256, hideen4=128, hideen5=64, num_classes=2):
    """Deterministic synthetic Linear params (weights stored as (in, out)), f32."""
    keys = jax.random.split(key, 8)

    def linear(kw, kb, fan_in, fan_out):
        # PyTorch nn.Linear default: U(-1/sqrt(fan_in), 1/sqrt(fan_in))
        bound = 1.0 / jnp.sqrt(jnp.float32(fan_in))
        w = jax.random.uniform(kw, (fan_in, fan_out), jnp.float32, -bound, bound)
        b = jax.random.uniform(kb, (1, fan_out), jnp.float32, -bound, bound)
        return w, b

    w2, b2 = linear(keys[0], keys[1], hideen2, hideen3)
    w3, b3 = linear(keys[2], keys[3], hideen3, hideen4)
    w4, b4 = linear(keys[4], keys[5], hideen4, hideen5)
    w5, b5 = linear(keys[6], keys[7], hideen5, num_classes)
    return dict(w2=w2, b2=b2, w3=w3, b3=b3, w4=w4, b4=b4, w5=w5, b5=b5)


def pack_params(params):
    """Pad trailing dims to 128 lanes, fuse fc4·fc5 in f32, cast weights to bf16
    (biases stay f32)."""
    h2, h3 = params["w2"].shape
    h4 = params["w3"].shape[1]
    nc = params["w5"].shape[1]

    h3p = _round_up(h3, LANE)
    h4p = _round_up(h4, LANE)
    ncp = _round_up(nc, LANE)

    w2 = _pad2d(params["w2"], h2, h3p).astype(jnp.bfloat16)
    b2 = _pad2d(params["b2"], 1, h3p)

    w3 = _pad2d(params["w3"], h3p, h4p).astype(jnp.bfloat16)
    b3 = _pad2d(params["b3"], 1, h4p)

    # fc4 and fc5 have no activation between them -> fuse in f32, then cast.
    w45_f32 = params["w4"] @ params["w5"]                   # (h4, nc)
    b45_f32 = params["b4"] @ params["w5"] + params["b5"]    # (1, nc)
    w45 = _pad2d(w45_f32, h4p, ncp).astype(jnp.bfloat16)
    b45 = _pad2d(b45_f32, 1, ncp)

    return dict(w2=w2, b2=b2, w3=w3, b3=b3, w45=w45, b45=b45, num_classes=nc)


# ----------------------------------------------------------------------------
# References
# ----------------------------------------------------------------------------
def reference_forward_f32(x1, x2, p):
    """Pure-JAX f32 reference of the PyTorch forward."""
    x = jnp.concatenate([x1, x2], axis=1)
    h = jnp.where(x @ p["w2"] + p["b2"] >= 0,
                  x @ p["w2"] + p["b2"], NEG_SLOPE * (x @ p["w2"] + p["b2"]))
    h = jnp.where(h @ p["w3"] + p["b3"] >= 0,
                  h @ p["w3"] + p["b3"], NEG_SLOPE * (h @ p["w3"] + p["b3"]))
    h = h @ p["w4"] + p["b4"]
    h = h @ p["w5"] + p["b5"]
    return h


def reference_forward_bf16(x1, x2, packed):
    """Pure-JAX reference mimicking the kernel's bf16-operand / f32-acc math."""
    bf = jnp.bfloat16
    x = jnp.concatenate([x1, x2], axis=1).astype(bf)

    def mm(a, w):
        return jnp.dot(a.astype(bf), w, preferred_element_type=jnp.float32)

    h = _leaky_relu(mm(x, packed["w2"]) + packed["b2"])
    h = _leaky_relu(mm(h, packed["w3"]) + packed["b3"])
    h = mm(h, packed["w45"]) + packed["b45"]
    return h[:, :packed["num_classes"]]


# ----------------------------------------------------------------------------
if __name__ == "__main__":
    key = jax.random.PRNGKey(0)
    k_params, k_x1, k_x2 = jax.random.split(key, 3)

    # hideen2 = 128  =>  x1 and x2 each carry 64 features, batch = 8
    B = 8
    hideen2 = 128
    params = init_params(k_params)

    x1 = jax.random.normal(k_x1, (B, hideen2 // 2), jnp.float32)
    x2 = jax.random.normal(k_x2, (B, hideen2 // 2), jnp.float32)

    packed = pack_params(params)

    out = server_alexnet_forward(x1, x2, packed)
    out = jax.block_until_ready(out)
    assert out.shape == (B, 2), out.shape

    # Tight check against a reference that uses identical bf16-operand math.
    ref_bf16 = reference_forward_bf16(x1, x2, packed)
    assert jnp.allclose(out, ref_bf16, atol=2e-3, rtol=2e-3), "mismatch vs bf16 reference"

    # Loose check against the exact f32 PyTorch-equivalent forward
    # (bf16 weights => logits match f32 math only to ~5e-2).
    ref_f32 = reference_forward_f32(x1, x2, params)
    assert jnp.allclose(out, ref_f32, atol=5e-2, rtol=5e-2), "mismatch vs f32 reference"

    print("KERNEL_OK")
</pallas_src>

<mosaic_0001>
module attributes {stable_mosaic.version = 11 : i64} {
  func.func @server_alexnet_kernel(%arg0: i32, %arg1: memref<16x128xbf16, #tpu.memory_space<vmem>>, %arg2: memref<128x256xbf16, #tpu.memory_space<vmem>>, %arg3: memref<1x256xf32, #tpu.memory_space<vmem>>, %arg4: memref<256x128xbf16, #tpu.memory_space<vmem>>, %arg5: memref<1x128xf32, #tpu.memory_space<vmem>>, %arg6: memref<128x128xbf16, #tpu.memory_space<vmem>>, %arg7: memref<1x128xf32, #tpu.memory_space<vmem>>, %arg8: memref<16x2xf32, #tpu.memory_space<vmem>>) attributes {dimension_semantics = [#tpu.dimension_semantics<parallel>], iteration_bounds = array<i64: 1>, scalar_prefetch = 0 : i64, scratch_operands = 0 : i64, tpu.core_type = #tpu.core_type<tc>, window_params = [{transform_indices = @transform_0, window_bounds = array<i64: 16, 128>}, {pipeline_mode = #tpu.pipeline_mode<synchronous>, transform_indices = @transform_1, window_bounds = array<i64: 128, 256>}, {pipeline_mode = #tpu.pipeline_mode<synchronous>, transform_indices = @transform_2, window_bounds = array<i64: 1, 256>}, {pipeline_mode = #tpu.pipeline_mode<synchronous>, transform_indices = @transform_3, window_bounds = array<i64: 256, 128>}, {pipeline_mode = #tpu.pipeline_mode<synchronous>, transform_indices = @transform_4, window_bounds = array<i64: 1, 128>}, {pipeline_mode = #tpu.pipeline_mode<synchronous>, transform_indices = @transform_5, window_bounds = array<i64: 128, 128>}, {pipeline_mode = #tpu.pipeline_mode<synchronous>, transform_indices = @transform_6, window_bounds = array<i64: 1, 128>}, {transform_indices = @transform_7, window_bounds = array<i64: 16, 2>}]} {
    %c0 = arith.constant 0 : index
    %c0_0 = arith.constant 0 : index
    %0 = vector.load %arg1[%c0, %c0_0] : memref<16x128xbf16, #tpu.memory_space<vmem>>, vector<16x128xbf16>
    %c0_1 = arith.constant 0 : index
    %c0_2 = arith.constant 0 : index
    %1 = vector.load %arg2[%c0_1, %c0_2] : memref<128x256xbf16, #tpu.memory_space<vmem>>, vector<128x256xbf16>
    %cst = arith.constant dense<0.000000e+00> : vector<16x256xf32>
    %2 = tpu.matmul %0, %1, %cst {dimension_numbers = #tpu.dot_dimension_numbers<[1], [0], [0], [1], [0, 0, 1, 1], [], []>} : vector<16x128xbf16>, vector<128x256xbf16>, vector<16x256xf32> -> vector<16x256xf32>
    %c0_3 = arith.constant 0 : index
    %c0_4 = arith.constant 0 : index
    %3 = vector.load %arg3[%c0_3, %c0_4] : memref<1x256xf32, #tpu.memory_space<vmem>>, vector<1x256xf32>
    %4 = vector.broadcast %3 : vector<1x256xf32> to vector<16x256xf32>
    %5 = arith.addf %2, %4 : vector<16x256xf32>
    %cst_5 = arith.constant 0.00999999977 : f32
    %6 = vector.broadcast %cst_5 : f32 to vector<16x256xf32>
    %7 = arith.mulf %6, %5 : vector<16x256xf32>
    %8 = arith.maximumf %5, %7 : vector<16x256xf32>
    %9 = arith.truncf %8 : vector<16x256xf32> to vector<16x256xbf16>
    %c0_6 = arith.constant 0 : index
    %c0_7 = arith.constant 0 : index
    %10 = vector.load %arg4[%c0_6, %c0_7] : memref<256x128xbf16, #tpu.memory_space<vmem>>, vector<256x128xbf16>
    %cst_8 = arith.constant dense<0.000000e+00> : vector<16x128xf32>
    %11 = tpu.matmul %9, %10, %cst_8 {dimension_numbers = #tpu.dot_dimension_numbers<[1], [0], [0], [1], [0, 0, 1, 1], [], []>} : vector<16x256xbf16>, vector<256x128xbf16>, vector<16x128xf32> -> vector<16x128xf32>
    %c0_9 = arith.constant 0 : index
    %c0_10 = arith.constant 0 : index
    %12 = vector.load %arg5[%c0_9, %c0_10] : memref<1x128xf32, #tpu.memory_space<vmem>>, vector<1x128xf32>
    %13 = vector.broadcast %12 : vector<1x128xf32> to vector<16x128xf32>
    %14 = arith.addf %11, %13 : vector<16x128xf32>
    %cst_11 = arith.constant 0.00999999977 : f32
    %15 = vector.broadcast %cst_11 : f32 to vector<16x128xf32>
    %16 = arith.mulf %15, %14 : vector<16x128xf32>
    %17 = arith.maximumf %14, %16 : vector<16x128xf32>
    %18 = arith.truncf %17 : vector<16x128xf32> to vector<16x128xbf16>
    %c0_12 = arith.constant 0 : index
    %c0_13 = arith.constant 0 : index
    %19 = vector.load %arg6[%c0_12, %c0_13] : memref<128x128xbf16, #tpu.memory_space<vmem>>, vector<128x128xbf16>
    %cst_14 = arith.constant dense<0.000000e+00> : vector<16x128xf32>
    %20 = tpu.matmul %18, %19, %cst_14 {dimension_numbers = #tpu.dot_dimension_numbers<[1], [0], [0], [1], [0, 0, 1, 1], [], []>} : vector<16x128xbf16>, vector<128x128xbf16>, vector<16x128xf32> -> vector<16x128xf32>
    %c0_15 = arith.constant 0 : index
    %c0_16 = arith.constant 0 : index
    %21 = vector.load %arg7[%c0_15, %c0_16] : memref<1x128xf32, #tpu.memory_space<vmem>>, vector<1x128xf32>
    %22 = vector.broadcast %21 : vector<1x128xf32> to vector<16x128xf32>
    %23 = arith.addf %20, %22 : vector<16x128xf32>
    %24 = vector.extract_strided_slice %23 {offsets = [0, 0], sizes = [16, 2], strides = [1, 1]} : vector<16x128xf32> to vector<16x2xf32>
    %c0_17 = arith.constant 0 : index
    %c0_18 = arith.constant 0 : index
    %25 = vector.load %arg8[%c0_17, %c0_18] : memref<16x2xf32, #tpu.memory_space<vmem>>, vector<16x2xf32>
    tpu.vector_store %arg8[%c0_17, %c0_18], %24 {strides = array<i32>} : memref<16x2xf32, #tpu.memory_space<vmem>>, vector<16x2xf32>,
    return
  }
  func.func @transform_0(%arg0: i32) -> (i32, i32) {
    %c0_i32 = arith.constant 0 : i32
    %c0_i32_0 = arith.constant 0 : i32
    return %arg0, %c0_i32 : i32, i32
  }
  func.func @transform_1(%arg0: i32) -> (i32, i32) {
    %c0_i32 = arith.constant 0 : i32
    %c0_i32_0 = arith.constant 0 : i32
    %c0_i32_1 = arith.constant 0 : i32
    return %c0_i32, %c0_i32_0 : i32, i32
  }
  func.func @transform_2(%arg0: i32) -> (i32, i32) {
    %c0_i32 = arith.constant 0 : i32
    %c0_i32_0 = arith.constant 0 : i32
    %c0_i32_1 = arith.constant 0 : i32
    return %c0_i32, %c0_i32_0 : i32, i32
  }
  func.func @transform_3(%arg0: i32) -> (i32, i32) {
    %c0_i32 = arith.constant 0 : i32
    %c0_i32_0 = arith.constant 0 : i32
    %c0_i32_1 = arith.constant 0 : i32
    return %c0_i32, %c0_i32_0 : i32, i32
  }
  func.func @transform_4(%arg0: i32) -> (i32, i32) {
    %c0_i32 = arith.constant 0 : i32
    %c0_i32_0 = arith.constant 0 : i32
    %c0_i32_1 = arith.constant 0 : i32
    return %c0_i32, %c0_i32_0 : i32, i32
  }
  func.func @transform_5(%arg0: i32) -> (i32, i32) {
    %c0_i32 = arith.constant 0 : i32
    %c0_i32_0 = arith.constant 0 : i32
    %c0_i32_1 = arith.constant 0 : i32
    return %c0_i32, %c0_i32_0 : i32, i32
  }
  func.func @transform_6(%arg0: i32) -> (i32, i32) {
    %c0_i32 = arith.constant 0 : i32
    %c0_i32_0 = arith.constant 0 : i32
    %c0_i32_1 = arith.constant 0 : i32
    return %c0_i32, %c0_i32_0 : i32, i32
  }
  func.func @transform_7(%arg0: i32) -> (i32, i32) {
    %c0_i32 = arith.constant 0 : i32
    %c0_i32_0 = arith.constant 0 : i32
    return %arg0, %c0_i32 : i32, i32
  }
}

</mosaic_0001>

<bundles_post_ra>
// kernel: tpu_custom_call.1
= control target key start
LH: loop header
LB: loop body
LE: loop exit
PB: predicated region body
PF: predicated region fallthrough
CT: control target
= control target key end

     0   :  { %12 = vsyncpa [#allocation3], 0  ;;  %s872_s0 = inlined_call_operand.hbm [shape: bf16[16,128], index: 0, kind: input, shape index: {}]   ;;  %s873_s1 = inlined_call_operand.hbm [shape: bf16[128,256], index: 1, kind: input, shape index: {}]   ;;  %s874_s2 = inlined_call_operand.vmem [shape: f32[1,256], index: 2, kind: input, shape index: {}]   ;;  %s875_s3 = inlined_call_operand.hbm [shape: bf16[256,128], index: 3, kind: input, shape index: {}]   ;;  %s876_s4 = inlined_call_operand.vmem [shape: f32[1,128], index: 4, kind: input, shape index: {}]   ;;  %s877_s5 = inlined_call_operand.hbm [shape: bf16[128,128], index: 5, kind: input, shape index: {}]   ;;  %s878_s6 = inlined_call_operand.vmem [shape: f32[1,128], index: 6, kind: input, shape index: {}]   ;;  %s879_s7 = inlined_call_operand.vmem [shape: f32[16,2], index: 7, kind: output, shape index: {}]  }
   0x1   :  { %13 = vsyncpa [#allocation5], 0 }
   0x2   :  { %14 = vsyncpa [#allocation8], 0  ;;  %s794_s24 = smov [#allocation4]  }
   0x3   :  { %s32_s25 = sshll.u32 %s794_s24, 4  ;;  %s33_s25 = int_to_ptr.vmem [resolvable:$true] %s32_s25 }
   0x4   :  { %s716_s26 = scalar_lea.vmem %s33_s25, 2048  ;;  %p721_p1 = scmp.lt.s32.totalorder %s33_s25, %s33_s25 }
   0x5   :  { %p717_p0 = scmp.ne.s32.totalorder %s33_s25, %s716_s26  ;;  %p722_p2 = scmp.lt.s32.totalorder %s716_s26, %s716_s26 }
   0x7   :  { %p723_p3 = por %p722_p2, %p721_p1 }
   0x9   :  { %p724_p4 = pnand %p723_p3, %p717_p0 }
   0xb   :  { %727 = shalt.err (!%p724_p4)
}
   0xc   :  { %s795_s27 = smov 128   ;;  %s796_s28 = smov 8  }
   0xd   :  { %38 = dma.hbm_to_vmem [thread:$0]  %s873_s1, 2048, %s33_s25, [#allocation5], %s795_s27, %s795_s27, %s796_s28  }
   0xe   :  { %s797_s8 = smov [#allocation2]  }
   0xf   :  { %s20_s9 = sshll.u32 %s797_s8, 4  ;;  %s21_s9 = int_to_ptr.vmem [resolvable:$true] %s20_s9 }
  0x10   :  { %s736_s10 = scalar_lea.vmem %s21_s9, 128  ;;  %p741_p6 = scmp.lt.s32.totalorder %s21_s9, %s21_s9 }
  0x11   :  { %p737_p5 = scmp.ne.s32.totalorder %s21_s9, %s736_s10  ;;  %p742_p7 = scmp.lt.s32.totalorder %s736_s10, %s736_s10 }
  0x13   :  { %p743_p8 = por %p742_p7, %p741_p6 }
  0x15   :  { %p744_p9 = pnand %p743_p8, %p737_p5 }
  0x17   :  { %747 = shalt.err (!%p744_p9)
}
  0x18   :  { %s798_s11 = smov 64   ;;  %s799_s12 = smov 4  }
  0x19   :  { %26 = dma.hbm_to_vmem [thread:$0]  %s872_s0, 128, %s21_s9, [#allocation3], %s798_s11, %s798_s11, %s799_s12  }
  0x1a   :  { %s800_s15 = smov [#allocation6]   ;;  %s801_s17 = smov [#allocation7]  }
  0x1b   :  { %s46_s16 = sshll.u32 %s800_s15, 4  ;;  %s60_s1 = sshll.u32 %s801_s17, 4  ;;  %s47_s16 = int_to_ptr.vmem [resolvable:$true] %s46_s16  ;;  %s61_s1 = int_to_ptr.vmem [resolvable:$true] %s60_s1 }
  0x1c   :  { %s756_s18 = scalar_lea.vmem %s47_s16, 2048  ;;  %p761_p11 = scmp.lt.s32.totalorder %s47_s16, %s47_s16 }
  0x1d   :  { %p757_p10 = scmp.ne.s32.totalorder %s47_s16, %s756_s18  ;;  %p762_p12 = scmp.lt.s32.totalorder %s756_s18, %s756_s18 }
  0x1f   :  { %p763_p13 = por %p762_p12, %p761_p11 }
  0x21   :  { %p764_p0 = pnand %p763_p13, %p757_p10 }
  0x23   :  { %767 = shalt.err (!%p764_p0)
}
  0x24   :  { %52 = dma.hbm_to_vmem [thread:$0]  %s875_s3, 2048, %s47_s16, [#allocation5], %s798_s11, %s798_s11, %s799_s12  }
  0x25   :  { %s776_s21 = scalar_lea.vmem %s61_s1, 1024  ;;  %p781_p2 = scmp.lt.s32.totalorder %s61_s1, %s61_s1 }
  0x26   :  { %p777_p1 = scmp.ne.s32.totalorder %s61_s1, %s776_s21  ;;  %p782_p3 = scmp.lt.s32.totalorder %s776_s21, %s776_s21 }
  0x28   :  { %p783_p4 = por %p782_p3, %p781_p2 }
  0x2a   :  { %p784_p5 = pnand %p783_p4, %p777_p1 }
  0x2c   :  { %787 = shalt.err (!%p784_p5)
}
  0x2d   :  { %66 = dma.hbm_to_vmem [thread:$0]  %s877_s5, 1024, %s61_s1, [#allocation8], %s798_s11, %s798_s11, %s799_s12  }
  0x2e   :  { %788 = dma.done.wait [#allocation3], 128  }
  0x2f   :  { %789 = vsyncadd [#allocation3], 4294967168 }
  0x30   :  { %790 = dma.done.wait [#allocation5], 4096  }
  0x31   :  { %791 = vsyncadd [#allocation5], 4294963200 }
  0x32   :  { %792 = dma.done.wait [#allocation8], 1024  }
  0x33   :  { %793 = vsyncadd [#allocation8], 4294966272  ;;  %v802_v0 = vmov 0   ;;  %v659_v1 = vld [vmem:[#allocation4 + $0x74] ss:$8 sps:$4 sm:$0xff]   ;;  %v688_v16 = vld [vmem:[#allocation6 + $0x68] sm:$0xff]   ;;  %v102_v39 = vlaneseq }
  0x34   :  { %230 = vmatprep.mubr.bf16.mxu0 %v802_v0  ;;  %v661_v2 = vld [vmem:[#allocation4 + $0x70] ss:$8 sps:$4 sm:$0xff]   ;;  %198 = vmatprep.subr.bf16.mxu0 %v659_v1  ;;  %v662_v3 = vld [vmem:[#allocation4 + $0x64] ss:$8 sps:$4 sm:$0xff]   ;;  %v664_v4 = vld [vmem:[#allocation4 + $0x60] ss:$8 sps:$4 sm:$0xff]  }
  0x35   :  { %199 = vmatpush1.bf16.msra.mxu0 %v661_v2  ;;  %v665_v5 = vld [vmem:[#allocation4 + $0x54] ss:$8 sps:$4 sm:$0xff]   ;;  %v667_v6 = vld [vmem:[#allocation4 + $0x50] ss:$8 sps:$4 sm:$0xff]   ;;  %v668_v7 = vld [vmem:[#allocation4 + $0x44] ss:$8 sps:$4 sm:$0xff]  }
  0x36   :  { %200 = vmatprep.subr.bf16.mxu0 %v662_v3  ;;  %v670_v8 = vld [vmem:[#allocation4 + $0x40] ss:$8 sps:$4 sm:$0xff]   ;;  %v671_v9 = vld [vmem:[#allocation4 + $0x34] ss:$8 sps:$4 sm:$0xff]   ;;  %v673_v11 = vld [vmem:[#allocation4 + $0x30] ss:$8 sps:$4 sm:$0xff]  }
  0x37   :  { %v684_v10 = vld [vmem:[#allocation6 + $0x78] sm:$0xff]   ;;  %v674_v13 = vld [vmem:[#allocation4 + $0x24] ss:$8 sps:$4 sm:$0xff]   ;;  %v686_v14 = vld [vmem:[#allocation6 + $0x70] sm:$0xff]   ;;  %v803_v35 = vmov 0.0   ;;  %v103_v40 = vshrl.u32 %v102_v39, 7 }
  0x38   :  { %v685_v12 = vld [vmem:[#allocation6 + $0x38] sm:$0xff]   ;;  %597 = vmatprep.subr.bf16.mxu1 %v684_v10  ;;  %v687_v15 = vld [vmem:[#allocation6 + $0x30] sm:$0xff]   ;;  %v676_v17 = vld [vmem:[#allocation4 + $0x20] ss:$8 sps:$4 sm:$0xff]   ;;  %vm804_vm0 = vmmov 0   ;;  %vm544_vm1 = vcmask 15360  }
  0x39   :  { %201 = vmatpush1.bf16.msra.mxu0 %v664_v4  ;;  %598 = vmatpush3.bf16.msra.mxu1 %v685_v12  ;;  %v677_v18 = vld [vmem:[#allocation4 + $0x14] ss:$8 sps:$4 sm:$0xff]   ;;  %v689_v19 = vld [vmem:[#allocation6 + $0x28] sm:$0xff]   ;;  %v690_v20 = vld [vmem:[#allocation6 + $0x60] sm:$0xff]   ;;  %v108_v41 = vsub.s32 1, %v103_v40  ;;  %v104_v42 = vsub.s32 0, %v103_v40 }
  0x3a   :  { %202 = vmatprep.subr.bf16.mxu0 %v665_v5  ;;  %599 = vmatprep.subr.bf16.mxu1 %v686_v14  ;;  %v679_v21 = vld [vmem:[#allocation4 + $0x10] ss:$8 sps:$4 sm:$0xff]   ;;  %v691_v22 = vld [vmem:[#allocation6 + $0x20] sm:$0xff]   ;;  %v696_v30 = vld [vmem:[#allocation6 + $0x48] sm:$0xff]  }
  0x3b   :  { %v680_v23 = vld [vmem:[#allocation4 + $0x4] ss:$8 sps:$4 sm:$0xff]   ;;  %v682_v24 = vld [vmem:[#allocation4] ss:$8 sps:$4 sm:$0xff]   ;;  %v683_v25 = vld [vmem:[#allocation2] sm:$0xff]  }
  0x3c   :  { %v692_v26 = vld [vmem:[#allocation6 + $0x58] sm:$0xff]   ;;  %v694_v28 = vld [vmem:[#allocation6 + $0x50] sm:$0xff]   ;;  %v697_v31 = vld [vmem:[#allocation6 + $0x8] sm:$0xff]  }
  0x3d   :  { %203 = vmatpush1.bf16.msra.mxu0 %v667_v6  ;;  %600 = vmatpush3.bf16.msra.mxu1 %v687_v15  ;;  %v693_v27 = vld [vmem:[#allocation6 + $0x18] sm:$0xff]   ;;  %v695_v29 = vld [vmem:[#allocation6 + $0x10] sm:$0xff]   ;;  %v698_v32 = vld [vmem:[#allocation6 + $0x40] sm:$0xff]  }
  0x3e   :  { %204 = vmatprep.subr.bf16.mxu0 %v668_v7  ;;  %601 = vmatprep.subr.bf16.mxu1 %v688_v16  ;;  %v699_v33 = vld [vmem:[#allocation6] sm:$0xff]   ;;  %v700_v34 = vld [vmem:[#allocation7 + $0x38] sm:$0xff]   ;;  %v701_v36 = vld [vmem:[#allocation7 + $0x30] sm:$0xff]  }
  0x3f   :  { %v702_v37 = vld [vmem:[#allocation7 + $0x28] sm:$0xff]   ;;  %v703_v38 = vld [vmem:[#allocation7 + $0x20] sm:$0xff]   ;;  %v100_v43 = vld [vmem:[%s874_s2] sm:$0x3] }
  0x40   :  { %v109_v44 = vrot.slane %v100_v43, %v108_v41  ;;  %v105_v45 = vrot.slane %v100_v43, %v104_v42  ;;  %v704_v0 = vld [vmem:[#allocation7 + $0x18] sm:$0xff]   ;;  %v705_v1 = vld [vmem:[#allocation7 + $0x10] sm:$0xff]   ;;  %v706_v2 = vld [vmem:[#allocation7 + $0x8] sm:$0xff]  }
  0x41   :  { %205 = vmatpush1.bf16.msra.mxu0 %v670_v8  ;;  %602 = vmatpush3.bf16.msra.mxu1 %v689_v19  ;;  %v707_v3 = vld [vmem:[#allocation7] sm:$0xff]   ;;  %v571_v5 = vld [vmem:[%s876_s4] ss:$0 sm:$0xff] }
  0x42   :  { %206 = vmatprep.subr.bf16.mxu0 %v671_v9  ;;  %603 = vmatprep.subr.bf16.mxu1 %v690_v20 }
  0x45   :  { %207 = vmatpush1.bf16.msra.mxu0 %v673_v11  ;;  %604 = vmatpush3.bf16.msra.mxu1 %v691_v22 }
  0x46   :  { %208 = vmatprep.subr.bf16.mxu0 %v674_v13  ;;  %605 = vmatprep.subr.bf16.mxu1 %v692_v26 }
  0x49   :  { %209 = vmatpush1.bf16.msra.mxu0 %v676_v17  ;;  %606 = vmatpush3.bf16.msra.mxu1 %v693_v27 }
  0x4a   :  { %210 = vmatprep.subr.bf16.mxu0 %v677_v18  ;;  %607 = vmatprep.subr.bf16.mxu1 %v694_v28  ;;  %v588_v18 = vld [vmem:[%s878_s6] ss:$0 sm:$0xff] }
  0x4d   :  { %211 = vmatpush1.bf16.msra.mxu0 %v679_v21  ;;  %608 = vmatpush3.bf16.msra.mxu1 %v695_v29 }
  0x4e   :  { %212 = vmatprep.subr.bf16.mxu0 %v680_v23  ;;  %609 = vmatprep.subr.bf16.mxu1 %v696_v30 }
  0x51   :  { %213 = vmatpush1.bf16.msra.mxu0 %v682_v24  ;;  %610 = vmatpush3.bf16.msra.mxu1 %v697_v31 }
  0x52   :  { %611 = vmatprep.subr.bf16.mxu1 %v698_v32  ;;  %628 = vmatprep.subr.bf16.mxu0 %v803_v35 }
  0x54   :  { %231 = vmatmul.mubr.bf16.vlgmr.msra.gmra.mxu0 %v683_v25 }
  0x55   :  { %612 = vmatpush3.bf16.msra.mxu1 %v699_v33  ;;  %629 = vmatpush3.bf16.msra.mxu0 %v700_v34 }
  0x56   :  { %630 = vmatprep.subr.bf16.mxu0 %v803_v35  ;;  %644 = vmatprep.mubr.msk.bf16.mxu0 %vm804_vm0, %v803_v35 }
  0x59   :  { %631 = vmatpush3.bf16.msra.mxu0 %v701_v36 }
  0x5a   :  { %632 = vmatprep.subr.bf16.mxu0 %v803_v35 }
  0x5d   :  { %633 = vmatpush3.bf16.msra.mxu0 %v702_v37 }
  0x5e   :  { %634 = vmatprep.subr.bf16.mxu0 %v803_v35 }
  0x61   :  { %635 = vmatpush3.bf16.msra.mxu0 %v703_v38 }
  0x62   :  { %636 = vmatprep.subr.bf16.mxu0 %v803_v35 }
  0x65   :  { %637 = vmatpush3.bf16.msra.mxu0 %v704_v0 }
  0x66   :  { %638 = vmatprep.subr.bf16.mxu0 %v803_v35 }
  0x69   :  { %639 = vmatpush3.bf16.msra.mxu0 %v705_v1 }
  0x6a   :  { %640 = vmatprep.subr.bf16.mxu0 %v803_v35 }
  0x6d   :  { %641 = vmatpush3.bf16.msra.mxu0 %v706_v2 }
  0x6e   :  { %642 = vmatprep.subr.bf16.mxu0 %v803_v35 }
  0x71   :  { %643 = vmatpush3.bf16.msra.mxu0 %v707_v3 }
 0x114   :  { %v232_v46 = vpop.f32.mrf.mxu0 }
 0x115   :  { %v233_v49 = vadd.f32 %v232_v46, %v105_v45 }
 0x116   :  { %v234_v47 = vpop.f32.mrf.mxu0 }
 0x117   :  { %v235_v48 = vadd.f32 %v234_v47, %v109_v44  ;;  %v241_v56 = vmul.f32 0.01, %v233_v49 }
 0x118   :  { %v236_v50 = vpop.f32.mrf.mxu0 }
 0x119   :  { %v237_v51 = vadd.f32 %v236_v50, %v105_v45  ;;  %v242_v53 = vmul.f32 0.01, %v235_v48  ;;  %v245_v61 = vmax.f32 %v233_v49, %v241_v56 }
 0x11a   :  { %v238_v52 = vpop.f32.mrf.mxu0 }
 0x11b   :  { %v243_v54 = vmul.f32 0.01, %v237_v51  ;;  %v239_v55 = vadd.f32 %v238_v52, %v109_v44  ;;  %v246_v59 = vmax.f32 %v235_v48, %v242_v53 }
 0x11d   :  { %v244_v57 = vmul.f32 0.01, %v239_v55  ;;  %v247_v58 = vmax.f32 %v237_v51, %v243_v54 }
 0x11f   :  { %v248_v60 = vmax.f32 %v239_v55, %v244_v57  ;;  %v249_v63 = vpack.c.bf16 %v247_v58, %v245_v61 }
 0x121   :  { %v250_v62 = vpack.c.bf16 %v248_v60, %v246_v59 }
 0x123   :  { %418 = vmatprep.mubr.bf16.mxu1 %v250_v62 }
 0x124   :  { %419 = vmatmul.mubr.bf16.vlgmr.msra.gmra.mxu1 %v249_v63 }
 0x1e4   :  { %v613_v4 = vpop.f32.mrf.mxu1 }
 0x1e6   :  { %v614_v6 = vpop.f32.mrf.mxu1 }
 0x1e7   :  { %v615_v7 = vadd.f32 %v614_v6, %v613_v4 }
 0x1e8   :  { %v616_v8 = vpop.f32.mrf.mxu1 }
 0x1e9   :  { %v421_v9 = vadd.f32 %v615_v7, %v571_v5 }
 0x1ea   :  { %v617_v10 = vpop.f32.mrf.mxu1 }
 0x1eb   :  { %v618_v11 = vadd.f32 %v617_v10, %v616_v8  ;;  %v427_v12 = vmul.f32 0.01, %v421_v9 }
 0x1ed   :  { %v424_v13 = vadd.f32 %v618_v11, %v571_v5  ;;  %v429_v15 = vmax.f32 %v421_v9, %v427_v12 }
 0x1ef   :  { %v428_v14 = vmul.f32 0.01, %v424_v13 }
 0x1f1   :  { %v430_v16 = vmax.f32 %v424_v13, %v428_v14 }
 0x1f3   :  { %v431_v17 = vpack.c.bf16 %v430_v16, %v429_v15 }
 0x1f5   :  { %645 = vmatmul.mubr.bf16.vlgmr.msra.gmra.mxu0 %v431_v17 }
 0x2b5   :  { %v537_v19 = vpop.f32.mrf.mxu0 }
 0x2b6   :  { %v538_v20 = vadd.f32 %v588_v18, %v537_v19 }
 0x2b7   :  { %v646_v21 = vpop.f32.mrf.mxu0 }
 0x2b8   :  { %545 = vst.msk [vmem:[%s879_s7] sm:$0xff] %vm544_vm1, %v538_v20 }
 0x2b9   :  { %v540_v22 = vpop.f32.mrf.mxu0 }
 0x2ba   :  { %v541_v23 = vadd.f32 %v588_v18, %v540_v22 }
 0x2bb   :  { %v647_v24 = vpop.f32.mrf.mxu0 }
 0x2bc   :  { %546 = vst.msk [vmem:[%s879_s7 + $0x8] sm:$0xff] %vm544_vm1, %v541_v23 }
 0x2bd   :  { %551 = vsyncpa [#allocation3], 1 }
 0x2be   :  { %552 = vsyncpa [#allocation5], 1 }
 0x2bf   :  { %553 = vsyncpa [#allocation8], 1 }

</bundles_post_ra>
